<compile_context>
chip_gen: v5e
topology: v5e:2x2
jax: 0.10.0
libtpu: 0.0.40
codegen_flags: <defaults>
</compile_context>

<pallas_src>
import jax
import jax.numpy as jnp
from jax.experimental import pallas as pl
from jax.experimental.pallas import tpu as pltpu


_LANES = 128        # vreg lane width
_MIN_SUBLANES = 8   # f32 sublane tile


def _prune_negative_kernel(x_ref, o_ref):
    x = x_ref[...]
    # Keep jnp.where (not jnp.maximum): torch.where zeroes NaNs; maximum would
    # propagate them. Compute is not the bottleneck anyway (HBM-bound).
    o_ref[...] = jnp.where(x > 0, x, jnp.zeros_like(x))


def _run_slab(x2d, tile_rows):
    """Run the elementwise kernel over a (rows, 128) f32-style slab."""
    rows, lanes = x2d.shape
    # Large fixed tile, rounded down to a sublane multiple; pl.cdiv grid means
    # we never shrink the tile just to divide `rows` exactly.
    tr = min(tile_rows, rows)
    tr = max(_MIN_SUBLANES, (tr // _MIN_SUBLANES) * _MIN_SUBLANES)
    grid = (pl.cdiv(rows, tr),)
    return pl.pallas_call(
        _prune_negative_kernel,
        out_shape=jax.ShapeDtypeStruct((rows, lanes), x2d.dtype),
        grid=grid,
        in_specs=[pl.BlockSpec((tr, lanes), lambda i: (i, 0))],
        out_specs=pl.BlockSpec((tr, lanes), lambda i: (i, 0)),
        compiler_params=pltpu.CompilerParams(
            dimension_semantics=("parallel",),
        ),
    )(x2d)


def prune_negative(img, *, tile_rows=4096):
    """Elementwise where(img > 0, img, 0) via a Pallas TPU kernel."""
    orig_shape = img.shape
    total = img.size
    chunk = _MIN_SUBLANES * _LANES  # 1024 elements

    if total % chunk == 0:
        # Fast path: no pad, no trailing slice — reshape only (no HBM copy).
        rows = total // _LANES
        x2d = img.reshape(rows, _LANES)
        out2d = _run_slab(x2d, tile_rows)
        return out2d.reshape(orig_shape)

    # Slow path (rare, awkward totals): pad the flat tail up to a (8,128)
    # chunk, run the kernel, slice back. Costs extra HBM copies but is only
    # hit for shapes whose element count is not a multiple of 1024.
    padded_total = ((total + chunk - 1) // chunk) * chunk
    flat = jnp.ravel(img)
    flat = jnp.pad(flat, (0, padded_total - total))
    rows = padded_total // _LANES
    out2d = _run_slab(flat.reshape(rows, _LANES), tile_rows)
    return out2d.reshape(-1)[:total].reshape(orig_shape)


if __name__ == "__main__":
    key = jax.random.PRNGKey(0)
    # Small NCHW image batch, consistent with a conv-style input.
    x = jax.random.normal(key, (2, 4, 16, 16), dtype=jnp.float32)

    out = prune_negative(x)
    out = jax.block_until_ready(out)

    # Reference check (plain JAX).
    ref = jnp.where(x > 0, x, 0.0)
    assert out.shape == x.shape
    assert out.dtype == x.dtype
    assert jnp.allclose(out, ref), "mismatch vs reference"

    # Also exercise the non-divisible (padded) path once for coverage.
    y = jax.random.normal(jax.random.PRNGKey(1), (3, 5, 7), dtype=jnp.float32)
    out_y = jax.block_until_ready(prune_negative(y))
    assert jnp.allclose(out_y, jnp.where(y > 0, y, 0.0)), "mismatch (padded path)"

    print("KERNEL_OK")
</pallas_src>

<mosaic_0001>
module attributes {stable_mosaic.version = 11 : i64} {
  func.func @_prune_negative_kernel(%arg0: i32, %arg1: memref<16x128xf32, #tpu.memory_space<vmem>>, %arg2: memref<16x128xf32, #tpu.memory_space<vmem>>) attributes {dimension_semantics = [#tpu.dimension_semantics<parallel>], iteration_bounds = array<i64: 1>, scalar_prefetch = 0 : i64, scratch_operands = 0 : i64, tpu.core_type = #tpu.core_type<tc>, window_params = [{transform_indices = @transform_0, window_bounds = array<i64: 16, 128>}, {transform_indices = @transform_1, window_bounds = array<i64: 16, 128>}]} {
    %c0 = arith.constant 0 : index
    %c0_0 = arith.constant 0 : index
    %0 = vector.load %arg1[%c0, %c0_0] : memref<16x128xf32, #tpu.memory_space<vmem>>, vector<16x128xf32>
    %cst = arith.constant 0.000000e+00 : f32
    %1 = vector.broadcast %cst : f32 to vector<16x128xf32>
    %2 = arith.cmpf ogt, %0, %1 : vector<16x128xf32>
    %cst_1 = arith.constant 0.000000e+00 : f32
    %3 = vector.broadcast %cst_1 : f32 to vector<16x128xf32>
    %4 = arith.select %2, %0, %3 : vector<16x128xi1>, vector<16x128xf32>
    %c0_2 = arith.constant 0 : index
    %c0_3 = arith.constant 0 : index
    %5 = vector.load %arg2[%c0_2, %c0_3] : memref<16x128xf32, #tpu.memory_space<vmem>>, vector<16x128xf32>
    tpu.vector_store %arg2[%c0_2, %c0_3], %4 {strides = array<i32>} : memref<16x128xf32, #tpu.memory_space<vmem>>, vector<16x128xf32>,
    return
  }
  func.func @transform_0(%arg0: i32) -> (i32, i32) {
    %c0_i32 = arith.constant 0 : i32
    %c0_i32_0 = arith.constant 0 : i32
    return %arg0, %c0_i32 : i32, i32
  }
  func.func @transform_1(%arg0: i32) -> (i32, i32) {
    %c0_i32 = arith.constant 0 : i32
    %c0_i32_0 = arith.constant 0 : i32
    return %arg0, %c0_i32 : i32, i32
  }
}

</mosaic_0001>

<bundles_post_ra>
// kernel: tpu_custom_call.1
= control target key start
LH: loop header
LB: loop body
LE: loop exit
PB: predicated region body
PF: predicated region fallthrough
CT: control target
= control target key end

     0   :  { %6 = vsyncpa [#allocation3], 0  ;;  %s128_s0 = inlined_call_operand.hbm [shape: f32[16,128], index: 0, kind: input, shape index: {}]   ;;  %s129_s1 = inlined_call_operand.hbm [shape: f32[16,128], index: 1, kind: output, shape index: {}]  }
   0x1   :  { %7 = vsyncpa [#allocation4], 0  ;;  %s12_s8 = sshll.u32 %s128_s0, 4  ;;  %s108_s9 = smov [#allocation2]   ;;  %s13_s8 = int_to_ptr.hbm [resolvable:$true] %s12_s8 }
   0x2   :  { %s14_s10 = sshll.u32 %s108_s9, 4  ;;  %s109_s11 = smov 128   ;;  %s15_s10 = int_to_ptr.vmem [resolvable:$true] %s14_s10 }
   0x3   :  { %s110_s12 = smov 8  }
   0x4   :  { %20 = dma.hbm_to_vmem [thread:$0]  %s13_s8, 256, %s15_s10, [#allocation3], %s109_s11, %s109_s11, %s110_s12  }
   0x5   :  { %104 = dma.done.wait [#allocation3], 256  }
   0x6   :  { %105 = vsyncadd [#allocation3], 4294967040  ;;  %s111_s13 = smov [#allocation5]   ;;  %s39_s17 = sshll.u32 %s129_s1, 4  ;;  %v25_v0 = vld [vmem:[#allocation2] sm:$0xff]  ;;  %v26_v1 = vld [vmem:[#allocation2 + $0x8] sm:$0xff]  ;;  %s40_s17 = int_to_ptr.hbm [resolvable:$true] %s39_s17 }
   0x7   :  { %s37_s14 = sshll.u32 %s111_s13, 4  ;;  %vm27_vm0 = vcmp.gt.f32.partialorder %v25_v0, 0.0  ;;  %vm28_vm1 = vcmp.gt.f32.partialorder %v26_v1, 0.0  ;;  %s38_s14 = int_to_ptr.vmem [resolvable:$true] %s37_s14 }
   0x8   :  { %v29_v2 = vsel %vm27_vm0, %v25_v0, 0.0  ;;  %v30_v3 = vsel %vm28_vm1, %v26_v1, 0.0 }
   0x9   :  { %31 = vst [vmem:[#allocation5] sm:$0xff] %v29_v2 }
   0xa   :  { %32 = vst [vmem:[#allocation5 + $0x8] sm:$0xff] %v30_v3 }
   0xb   :  { %45 = dma.vmem_to_hbm [thread:$0]  %s38_s14, 256, %s40_s17, [#allocation4], %s109_s11, %s109_s11, %s110_s12  }
   0xc   :  { %106 = dma.done.wait [#allocation4], 256  }
   0xd   :  { %107 = vsyncadd [#allocation4], 4294967040 }
   0xe   :  { %50 = vsyncpa [#allocation3], 1 }
   0xf   :  { %51 = vsyncpa [#allocation4], 1 }

</bundles_post_ra>
